<compile_context>
chip_gen: v5e
topology: v5e:2x2
jax: 0.10.0
libtpu: 0.0.40
codegen_flags: <defaults>
</compile_context>

<pallas_src>
import functools

import jax
import jax.numpy as jnp
from jax import lax
from jax.experimental import pallas as pl
from jax.experimental.pallas import tpu as pltpu


def _selfattention_kernel(x_ref, w_ref, b_ref, o_ref, *, d_k, d_v,
                          matmul_dtype):
    """Fused QKV projection + scaled-dot-product attention (one instance).

    x_ref : (S, F)   input  -- original (sample_size, n_features) layout
    w_ref : (D, S)   fused  -- [wq*1/sqrt(d_k); wk; wv], torch (out, in) layout
    b_ref : (D, 1)   f32    -- [bq*1/sqrt(d_k); bk; bv]
    o_ref : (d_v, F) f32    -- output, already in the module's return layout
    """
    x = x_ref[...].astype(matmul_dtype)
    w = w_ref[...].astype(matmul_dtype)   # no-op when weights stored in bf16

    # Single fused projection: qkv^T[d, f] = sum_s W[d, s] * x[s, f] + b[d]
    # (f32 accumulation on the MXU).  The 1/sqrt(d_k) scale is pre-folded
    # into the q rows of W and b.
    qkv_t = jnp.dot(w, x, preferred_element_type=jnp.float32) + b_ref[...]

    # Static slices of the fused projection (rows: q, then k, then v).
    q_t = qkv_t[0:d_k, :]                    # (d_k, F)  (already scaled)
    k_t = qkv_t[d_k:2 * d_k, :]              # (d_k, F)
    v_t = qkv_t[2 * d_k:2 * d_k + d_v, :]    # (d_v, F)

    # Scores s[f, g] = sum_d q^T[d, f] * k^T[d, g]  (A^T @ B form: only the
    # small d_k-row operand could ever need an XLU transpose, never an FxF
    # tensor).
    s = lax.dot_general(
        q_t.astype(matmul_dtype), k_t.astype(matmul_dtype),
        dimension_numbers=(((0,), (0,)), ((), ())),
        preferred_element_type=jnp.float32)

    # Numerically-stable softmax over dim=1 (the g axis), kept in float32.
    m = jnp.max(s, axis=1, keepdims=True)
    p = jnp.exp(s - m)
    l = jnp.sum(p, axis=1, keepdims=True)
    r = pl.reciprocal(l, approx=True)        # EUP estimate (otherwise-idle slot)
    r = r * (2.0 - l * r)                    # one Newton step -> f32 accuracy
    att = p * r

    # out^T[dv, f] = sum_g v^T[dv, g] * att[f, g]   (A @ B^T form; the FxF
    # `att` is the RHS-transposed operand the MXU consumes natively).
    # Written directly as (d_v, F): no wrapper-side final transpose.
    o_ref[...] = lax.dot_general(
        v_t.astype(matmul_dtype), att.astype(matmul_dtype),
        dimension_numbers=(((1,), (1,)), ((), ())),
        preferred_element_type=jnp.float32)


def fuse_params(wq, bq, wk, bk, wv, bv, d_k, weight_dtype=jnp.bfloat16):
    """Fuse torch-layout Linear params ONCE at parameter-load time.

    * Folds the 1/sqrt(d_k) attention scale into wq/bq (removes a per-call
      VPU multiply over the FxF score tile).
    * Stores the fused weight in `weight_dtype` (bf16 by default): halves
      HBM->VMEM DMA bytes + VMEM residency of the largest static operand.
    * Bias stays f32 (tiny; added to the f32 accumulator).
    """
    scale = 1.0 / (float(d_k) ** 0.5)
    w_fused = jnp.concatenate([wq * scale, wk, wv], axis=0)        # (2dk+dv, S)
    b_fused = jnp.concatenate([bq * scale, bk, bv], axis=0)[:, None]
    return w_fused.astype(weight_dtype), b_fused.astype(jnp.float32)


def selfattention_forward_batched(x, w_fused, b_fused, d_k, d_v,
                                  matmul_dtype=jnp.bfloat16):
    """x: (B, sample_size, n_features) -> (B, d_v, n_features) float32.

    The batch axis is a "parallel" grid dimension: amortizes launch/DMA
    overhead across instances and shards across v7x's 2 TensorCores.
    """
    B, sample_size, n_features = x.shape
    D = 2 * d_k + d_v
    assert w_fused.shape == (D, sample_size), w_fused.shape
    assert b_fused.shape == (D, 1), b_fused.shape

    kernel = functools.partial(_selfattention_kernel, d_k=d_k, d_v=d_v,
                               matmul_dtype=matmul_dtype)
    return pl.pallas_call(
        kernel,
        out_shape=jax.ShapeDtypeStruct((B, d_v, n_features), jnp.float32),
        grid=(B,),
        in_specs=[
            # Per-instance input tile; leading batch dim squeezed away.
            pl.BlockSpec((pl.Squeezed(), sample_size, n_features),
                         lambda b: (b, 0, 0)),
            # Weights/bias: constant block index -> stay resident in VMEM
            # across grid steps (no re-DMA).
            pl.BlockSpec((D, sample_size), lambda b: (0, 0)),
            pl.BlockSpec((D, 1), lambda b: (0, 0)),
        ],
        out_specs=pl.BlockSpec((pl.Squeezed(), d_v, n_features),
                               lambda b: (b, 0, 0)),
        compiler_params=pltpu.CompilerParams(
            dimension_semantics=("parallel",)),
    )(x, w_fused, b_fused)


def selfattention_forward(x, w_fused, b_fused, d_k, d_v,
                          matmul_dtype=jnp.bfloat16):
    """Single-instance API matching the PyTorch module.

    x: (sample_size, n_features) -> (d_v, n_features) float32.
    """
    out = selfattention_forward_batched(x[None], w_fused, b_fused, d_k, d_v,
                                        matmul_dtype=matmul_dtype)
    return out[0]


def _reference(x, params, d_k):
    wq, bq, wk, bk, wv, bv = params
    xT = x.T
    q = xT @ wq.T + bq
    k = xT @ wk.T + bk
    v = xT @ wv.T + bv
    s = (q @ k.T) / jnp.sqrt(jnp.float32(d_k))
    att = jax.nn.softmax(s, axis=1)
    return (att @ v).T


if __name__ == "__main__":
    # Small shapes consistent with the module.
    sample_size = 32   # in_features of the Linear layers
    n_features = 16    # "sequence" length after x.T
    d_k = 16
    d_v = 8
    batch = 2          # independent instances batched into one gridded call

    key = jax.random.PRNGKey(0)
    kx, kq, kbq, kk, kbk, kv, kbv = jax.random.split(key, 7)

    xb = jax.random.normal(kx, (batch, sample_size, n_features),
                           dtype=jnp.float32)

    # torch Linear shapes: W (out, in), b (out,)
    wq = jax.random.normal(kq, (d_k, sample_size), dtype=jnp.float32) * 0.1
    bq = jax.random.normal(kbq, (d_k,), dtype=jnp.float32) * 0.1
    wk = jax.random.normal(kk, (d_k, sample_size), dtype=jnp.float32) * 0.1
    bk = jax.random.normal(kbk, (d_k,), dtype=jnp.float32) * 0.1
    wv = jax.random.normal(kv, (d_v, sample_size), dtype=jnp.float32) * 0.1
    bv = jax.random.normal(kbv, (d_v,), dtype=jnp.float32) * 0.1
    params = (wq, bq, wk, bk, wv, bv)

    ref = jnp.stack([_reference(xb[i], params, d_k) for i in range(batch)])

    # ---- Strict-semantics check: f32 weights + f32 MXU operands. ----------
    w32, b32 = fuse_params(*params, d_k=d_k, weight_dtype=jnp.float32)
    out32 = selfattention_forward_batched(xb, w32, b32, d_k=d_k, d_v=d_v,
                                          matmul_dtype=jnp.float32)
    out32 = jax.block_until_ready(out32)
    assert out32.shape == (batch, d_v, n_features), out32.shape
    err32 = float(jnp.max(jnp.abs(out32 - ref)))
    assert jnp.allclose(out32, ref, atol=1e-4, rtol=1e-4), err32

    # ---- Default fast path: bf16 weights + bf16 MXU operands (f32 acc). ---
    w_fused, b_fused = fuse_params(*params, d_k=d_k)        # bf16 weights
    out_bf = selfattention_forward_batched(xb, w_fused, b_fused,
                                           d_k=d_k, d_v=d_v)  # bf16 default
    out_bf = jax.block_until_ready(out_bf)
    assert out_bf.shape == (batch, d_v, n_features), out_bf.shape
    err_bf = float(jnp.max(jnp.abs(out_bf - ref)))
    assert jnp.allclose(out_bf, ref, atol=3e-2, rtol=3e-2), err_bf

    # Single-instance API (matches the PyTorch module signature).
    out_single = selfattention_forward(xb[0], w_fused, b_fused, d_k=d_k,
                                       d_v=d_v)
    out_single = jax.block_until_ready(out_single)
    assert out_single.shape == (d_v, n_features), out_single.shape

    print("KERNEL_OK")
</pallas_src>

<mosaic_0001>
module attributes {stable_mosaic.version = 11 : i64} {
  func.func @_selfattention_kernel(%arg0: i32, %arg1: memref<1x32x16xf32, #tpu.memory_space<vmem>>, %arg2: memref<40x32xf32, #tpu.memory_space<vmem>>, %arg3: memref<40x1xf32, #tpu.memory_space<vmem>>, %arg4: memref<1x8x16xf32, #tpu.memory_space<vmem>>) attributes {dimension_semantics = [#tpu.dimension_semantics<parallel>], iteration_bounds = array<i64: 2>, scalar_prefetch = 0 : i64, scratch_operands = 0 : i64, tpu.core_type = #tpu.core_type<tc>, window_params = [{transform_indices = @transform_0, window_bounds = array<i64: 1, 32, 16>}, {pipeline_mode = #tpu.pipeline_mode<synchronous>, transform_indices = @transform_1, window_bounds = array<i64: 40, 32>}, {pipeline_mode = #tpu.pipeline_mode<synchronous>, transform_indices = @transform_2, window_bounds = array<i64: 40, 1>}, {transform_indices = @transform_3, window_bounds = array<i64: 1, 8, 16>}]} {
    %c0 = arith.constant 0 : index
    %c0_0 = arith.constant 0 : index
    %c0_1 = arith.constant 0 : index
    %0 = vector.load %arg1[%c0, %c0_0, %c0_1] : memref<1x32x16xf32, #tpu.memory_space<vmem>>, vector<1x32x16xf32>
    %1 = vector.shape_cast %0 : vector<1x32x16xf32> to vector<32x16xf32>
    %c0_2 = arith.constant 0 : index
    %c0_3 = arith.constant 0 : index
    %2 = vector.load %arg2[%c0_2, %c0_3] : memref<40x32xf32, #tpu.memory_space<vmem>>, vector<40x32xf32>
    %cst = arith.constant dense<0.000000e+00> : vector<40x16xf32>
    %3 = tpu.matmul %2, %1, %cst {dimension_numbers = #tpu.dot_dimension_numbers<[1], [0], [0], [1], [0, 0, 1, 1], [], []>} : vector<40x32xf32>, vector<32x16xf32>, vector<40x16xf32> -> vector<40x16xf32>
    %c0_4 = arith.constant 0 : index
    %c0_5 = arith.constant 0 : index
    %4 = vector.load %arg3[%c0_4, %c0_5] : memref<40x1xf32, #tpu.memory_space<vmem>>, vector<40x1xf32>
    %5 = vector.broadcast %4 : vector<40x1xf32> to vector<40x16xf32>
    %6 = arith.addf %3, %5 : vector<40x16xf32>
    %7 = vector.extract_strided_slice %6 {offsets = [0, 0], sizes = [16, 16], strides = [1, 1]} : vector<40x16xf32> to vector<16x16xf32>
    %8 = vector.extract_strided_slice %6 {offsets = [16, 0], sizes = [16, 16], strides = [1, 1]} : vector<40x16xf32> to vector<16x16xf32>
    %9 = vector.extract_strided_slice %6 {offsets = [32, 0], sizes = [8, 16], strides = [1, 1]} : vector<40x16xf32> to vector<8x16xf32>
    %cst_6 = arith.constant dense<0.000000e+00> : vector<16x16xf32>
    %10 = tpu.matmul %7, %8, %cst_6 {dimension_numbers = #tpu.dot_dimension_numbers<[0], [0], [1], [1], [0, 1, 1, 1], [], []>} : vector<16x16xf32>, vector<16x16xf32>, vector<16x16xf32> -> vector<16x16xf32>
    %cst_7 = arith.constant dense<0xFF800000> : vector<16xf32>
    %11 = vector.multi_reduction <maximumf>, %10, %cst_7 [1] : vector<16x16xf32> to vector<16xf32>
    %12 = vector.shape_cast %11 : vector<16xf32> to vector<16x1xf32>
    %13 = vector.broadcast %12 : vector<16x1xf32> to vector<16x16xf32>
    %14 = arith.subf %10, %13 : vector<16x16xf32>
    %15 = math.exp %14 : vector<16x16xf32>
    %cst_8 = arith.constant dense<0.000000e+00> : vector<16xf32>
    %16 = vector.multi_reduction <add>, %15, %cst_8 [1] : vector<16x16xf32> to vector<16xf32>
    %17 = vector.shape_cast %16 : vector<16xf32> to vector<16x1xf32>
    %18 = tpu.reciprocal %17 {approx = true} : vector<16x1xf32> -> vector<16x1xf32>
    %19 = arith.mulf %17, %18 : vector<16x1xf32>
    %cst_9 = arith.constant 2.000000e+00 : f32
    %20 = vector.broadcast %cst_9 : f32 to vector<16x1xf32>
    %21 = arith.subf %20, %19 : vector<16x1xf32>
    %22 = arith.mulf %18, %21 : vector<16x1xf32>
    %23 = vector.broadcast %22 : vector<16x1xf32> to vector<16x16xf32>
    %24 = arith.mulf %15, %23 : vector<16x16xf32>
    %cst_10 = arith.constant dense<0.000000e+00> : vector<8x16xf32>
    %25 = tpu.matmul %9, %24, %cst_10 {dimension_numbers = #tpu.dot_dimension_numbers<[1], [1], [0], [0], [0, 0, 1, 0], [], []>} : vector<8x16xf32>, vector<16x16xf32>, vector<8x16xf32> -> vector<8x16xf32>
    %c0_11 = arith.constant 0 : index
    %c0_12 = arith.constant 0 : index
    %c0_13 = arith.constant 0 : index
    %26 = vector.load %arg4[%c0_11, %c0_12, %c0_13] : memref<1x8x16xf32, #tpu.memory_space<vmem>>, vector<1x8x16xf32>
    %27 = vector.shape_cast %26 : vector<1x8x16xf32> to vector<8x16xf32>
    %28 = vector.shape_cast %25 : vector<8x16xf32> to vector<1x8x16xf32>
    tpu.vector_store %arg4[%c0_11, %c0_12, %c0_13], %28 {strides = array<i32>} : memref<1x8x16xf32, #tpu.memory_space<vmem>>, vector<1x8x16xf32>,
    return
  }
  func.func @transform_0(%arg0: i32) -> (i32, i32, i32) {
    %c0_i32 = arith.constant 0 : i32
    %c0_i32_0 = arith.constant 0 : i32
    %c0_i32_1 = arith.constant 0 : i32
    return %arg0, %c0_i32, %c0_i32_0 : i32, i32, i32
  }
  func.func @transform_1(%arg0: i32) -> (i32, i32) {
    %c0_i32 = arith.constant 0 : i32
    %c0_i32_0 = arith.constant 0 : i32
    %c0_i32_1 = arith.constant 0 : i32
    return %c0_i32, %c0_i32_0 : i32, i32
  }
  func.func @transform_2(%arg0: i32) -> (i32, i32) {
    %c0_i32 = arith.constant 0 : i32
    %c0_i32_0 = arith.constant 0 : i32
    %c0_i32_1 = arith.constant 0 : i32
    return %c0_i32, %c0_i32_0 : i32, i32
  }
  func.func @transform_3(%arg0: i32) -> (i32, i32, i32) {
    %c0_i32 = arith.constant 0 : i32
    %c0_i32_0 = arith.constant 0 : i32
    %c0_i32_1 = arith.constant 0 : i32
    return %arg0, %c0_i32, %c0_i32_0 : i32, i32, i32
  }
}

</mosaic_0001>

<bundles_post_ra>
// kernel: tpu_custom_call.1
= control target key start
LH: loop header
LB: loop body
LE: loop exit
PB: predicated region body
PF: predicated region fallthrough
CT: control target
= control target key end

     0   :  { %8 = vsyncpa [#allocation3], 0  ;;  %s747_s0 = inlined_call_operand.vmem [shape: f32[2,32,16], index: 0, kind: input, shape index: {}]   ;;  %s748_s1 = inlined_call_operand.vmem [shape: f32[40,32], index: 1, kind: input, shape index: {}]   ;;  %s749_s2 = inlined_call_operand.vmem [shape: f32[40,1], index: 2, kind: input, shape index: {}]   ;;  %s750_s3 = inlined_call_operand.hbm [shape: f32[2,8,16], index: 3, kind: output, shape index: {}]  }
   0x1   :  { %10 = vsyncpa [#allocation3 + $0x1], 0  ;;  %s617_s12 = smov 0   ;;  %s619_s13 = smov 0  }
   0x2   :  { %s621_s14 = smov 0   ;;  %s623_s15 = smov 0  }
   0x3 LB: > { %s638_s16 = sadd.s32 4294967295, %s594_s15   ;;  %s451_s17 = sadd.s32 4294967294, %s594_s15   ;;  %s594_s15 = sphi %s623_s15, %s756_s15   ;;  %s590_s14 = sphi %s621_s14, %s755_s14   ;;  %s586_s13 = sphi %s619_s13, %s754_s13   ;;  %s582_s12 = sphi %s617_s12, %s753_s12  }
   0x4   : > { %s642_s18 = sadd.s32 1, %s594_s15   ;;  %s91_s19 = sadd.s32 1, %s590_s14 }
   0x5   : > { %s88_s20 = ssub.s32 %s594_s15, %s642_s18  ;;  %p101_p0 = scmp.ne.s32.totalorder %s590_s14, %s586_s13 }
   0x6   : > { %p89_p1 = scmp.eq.s32.totalorder %s88_s20, 0  ;;  %p102_p2 = scmp.eq.s32.totalorder %s638_s16, 1 }
   0x7   : > { %p107_p3 = scmp.ne.s32.totalorder %s586_s13, %s582_s12  ;;  %p108_p4 = scmp.eq.s32.totalorder %s451_s17, 1 }
   0x8   : > { %s653_s21 = scalar_select %p89_p1, %s590_s14, %s91_s19  }
   0x9   : > { %p655_p5 = por %p102_p2, %p101_p0  ;;  %p659_p6 = por %p108_p4, %p107_p3 }
   0xa   : > { %p454_p7 = scmp.ge.s32.totalorder %s594_s15, 1  ;;  %p140_p8 = scmp.lt.s32.totalorder %s594_s15, 3 }
   0xc   : > { %p141_p9 = pnand %p454_p7, %p140_p8 }
   0xd   : > { %p164_p10 = scmp.lt.s32.totalorder (!%p141_p9), %s638_s16, 1  ;;  %s161_s4 = sand.u32 (!%p141_p9), 1, %s586_s13  }
   0xe   : > { %144 = sbr.rel (%p141_p9) target bundleno = 849 (0x351), region = 32  ;;  %s455_s5 = sshll.u32 (!%p141_p9), %s161_s4, 3 }
   0xf   : > { %s469_s6 = sshll.u32 (!%p141_p9), %s638_s16, 3  ;;  %s163_s10 = scalar_lea.vmem (!%p141_p9), [#allocation2], %s455_s5 }
  0x10   : > { %s387_s9 = scalar_lea.hbm (!%p141_p9), %s750_s3, %s469_s6  ;;  %s389_s11 = sshll.u32 (!%p141_p9), %s163_s10, 4  ;;  %s390_s11 = int_to_ptr.vmem [resolvable:$true] %s389_s11 }
  0x11   : > { %s391_s17 = sshll.u32 (!%p141_p9), %s387_s9, 4  ;;  %s377_s19 = scalar_lea.sflag (!%p141_p9), [#allocation3], %s161_s4  ;;  %s392_s17 = int_to_ptr.hbm [resolvable:$true] %s391_s17 }
  0x12   : > { %s546_s20 = sshra.s32 (!%p141_p9), %s392_s17, 4  ;;  %s547_s20 = int_to_ptr.hbm [resolvable:$true] %s546_s20 }
  0x13   : > { %v178_v0 = vld [vmem:[%s749_s2] sm:$0xff]  ;;  %v596_v1 = vmov 0   ;;  %s165_s26 = scalar_select %p164_p10, %s638_s16, 1  ;;  %v179_v4 = vld [vmem:[%s749_s2 + $0x8] sm:$0xff]  ;;  %vm208_vm0 = vcmask 261120   ;;  %v176_v9 = vld [vmem:[%s748_s1 + $0x18] sm:$0xff] }
  0x14   : > { %522 = vset.pattern.permute.xlu0 %v596_v1  ;;  %523 = vset.pattern.permute.xlu1 %v596_v1  ;;  %v173_v7 = vld [vmem:[%s748_s1] sm:$0xff]  ;;  %v174_v8 = vld [vmem:[%s748_s1 + $0x8] sm:$0xff]  ;;  %v175_v10 = vld [vmem:[%s748_s1 + $0x10] sm:$0xff]  ;;  %vm288_vm1 = vcmask 130048   ;;  %s548_s24 = scalar_lea.hbm %s547_s20, 8  ;;  %p553_p0 = scmp.lt.s32.totalorder %s547_s20, %s750_s3 }
  0x15   : > { %185 = vperm.xlu0 %522, %v178_v0   ;;  %s472_s27 = sshll.u32 %s165_s26, 5  ;;  %v181_v11 = vld [vmem:[%s749_s2 + $0x18] sm:$0xff]  ;;  %v180_v12 = vld [vmem:[%s749_s2 + $0x10] sm:$0xff]  ;;  %v177_v27 = vld [vmem:[%s748_s1 + $0x20] sm:$0xff]  ;;  %p549_p11 = scmp.ne.s32.totalorder %s547_s20, %s548_s24 }
  0x16   : > { %s168_s30 = scalar_lea.vmem %s747_s0, %s472_s27  ;;  %200 = vperm.xlu1 %523, %v181_v11   ;;  %v182_v32 = vld [vmem:[%s749_s2 + $0x20] sm:$0xff]  ;;  %s552_s26 = scalar_lea.hbm %s750_s3, 16 }
  0x17   : > { %v172_v2 = vld [vmem:[%s168_s30 + $0x18] sm:$0xff]  ;;  %v171_v3 = vld [vmem:[%s168_s30 + $0x10] sm:$0xff]  ;;  %v170_v5 = vld [vmem:[%s168_s30 + $0x8] sm:$0xff]  ;;  %p550_p12 = pnand %p549_p11, %p655_p5  ;;  %p554_p1 = scmp.lt.s32.totalorder %s552_s26, %s548_s24 }
  0x18   : > { %236 = vmatpush.msra.mxu0 %v172_v2  ;;  %474 = vmatpush.msra.mxu3 %v172_v2  ;;  %v169_v6 = vld [vmem:[%s168_s30] sm:$0xff] }
  0x19   : > { %473 = vmatpush.msra.mxu2 %v172_v2  ;;  %p551_p13 = pneg %p550_p12  ;;  %p555_p2 = por %p554_p1, %p553_p0 }
  0x1a   : > { %237 = vmatpush.msra.mxu0 %v171_v3  ;;  %476 = vmatpush.msra.mxu3 %v171_v3 }
  0x1b   : > { %475 = vmatpush.msra.mxu2 %v171_v3  ;;  %p556_p3 = pnand %p555_p2, %p551_p13 }
  0x1c   : > { %238 = vmatpush.msra.mxu0 %v170_v5  ;;  %478 = vmatpush.msra.mxu3 %v170_v5 }
  0x1d   : > { %190 = vperm.xlu0 %522, %v179_v4   ;;  %477 = vmatpush.msra.mxu2 %v170_v5 }
  0x1e   : > { %239 = vmatpush.msra.mxu0 %v169_v6  ;;  %480 = vmatpush.msra.mxu3 %v169_v6 }
  0x1f   : > { %458 = vmatmul.msk.f32.vlgmr.msra.gmra.mxu0 %vm208_vm0, %v173_v7  ;;  %479 = vmatpush.msra.mxu2 %v169_v6 }
  0x20   : > { %461 = vmatmul.msk.f32.vlgmr.msra.gmra.mxu3 %vm208_vm0, %v176_v9  ;;  %460 = vmatmul.msk.f32.vlgmr.msra.gmra.mxu2 %vm208_vm0, %v175_v10 }
  0x21   : > { %195 = vperm.xlu1 %523, %v180_v12  }
  0x27   : > { %459 = vmatmul.msk.f32.gmra.mxu0 %vm208_vm0, %v174_v8 }
  0x28   : > { %462 = vmatmul.msk.f32.gmra.mxu3 %vm208_vm0, %v177_v27 }
  0x87   : > { %v186_v13 = vpop.permute.xlu0 %185 }
  0x88   : > { %v201_v19 = vpop.permute.xlu1 %200 }
  0x8f   : > { %v191_v16 = vpop.permute.xlu0 %190 }
  0x93   : > { %v196_v20 = vpop.permute.xlu1 %195 }
  0x9c   : > { %v241_v14 = vpop.f32.mrf.mxu0 }
  0x9d   : > { %v242_v15 = vadd.f32 %v241_v14, %v186_v13 }
  0x9f   : > { %256 = vxpose.xlu2.b32.start [1/2] (short) (narrow) %v242_v15, 16 }
  0xa3   : > { %v250_v21 = vpop.f32.mrf.mxu3  ;;  %v247_v22 = vpop.f32.mrf.mxu2 }
  0xa4   : > { %v244_v17 = vpop.f32.mrf.mxu0  ;;  %v248_v23 = vadd.f32 %v247_v22, %v196_v20  ;;  %v251_v24 = vadd.f32 %v250_v21, %v201_v19 }
  0xa5   : > { %v245_v18 = vadd.f32 %v244_v17, %v191_v16 }
  0xa6   : > { %309 = vmatpush.msra.mxu1 %v251_v24 }
  0xa7   : > { %257 = vxpose.xlu2.b32.end [2/2] (short) (narrow) %v245_v18, 16 }
  0xa8   : > { %310 = vmatpush.msra.mxu1 %v248_v23 }
  0xab   : > { %v253_v54 = vpop.f32.mrf.mxu3 }
 0x138   : > { %v272_v25 = vpop.trf.xlu2 }
 0x139   : > { %463 = vmatmul.msk.f32.vlgmr.msra.gmra.mxu1 %vm288_vm1, %v272_v25 }
 0x140   : > { %v273_v26 = vpop.trf.xlu2 }
 0x141   : > { %464 = vmatmul.msk.f32.gmra.mxu1 %vm288_vm1, %v273_v26 }
 0x1b6   : > { %v312_v28 = vpop.f32.mrf.mxu1 }
 0x1b7   : > { %v318_v29 = vsel %vm288_vm1, %v312_v28, -inf }
 0x1b8   : > { %319 = vmax.xlane.f32.xlu1 %v318_v29 }
 0x1be   : > { %v315_v30 = vpop.f32.mrf.mxu1 }
 0x1bf   : > { %v321_v31 = vsel %vm288_vm1, %v315_v30, -inf }
 0x1c0   : > { %322 = vmax.xlane.f32.xlu0 %v321_v31 }
 0x1d1   : > { %205 = vperm.xlu1 %523, %v182_v32  }
 0x22b   : > { %v320_v33 = vpop.xlane.xlu1 %319 }
 0x22c   : > { %v324_v34 = vsub.f32 %v312_v28, %v320_v33 }
 0x22e   : > { %v326_v35 = vmul.f32 1.442695, %v324_v34 }
 0x230   : > { %524 = vpow2.f32 %v326_v35 }
 0x233   : > { %v323_v36 = vpop.xlane.xlu0 %322 }
 0x234   : > { %v325_v37 = vsub.f32 %v315_v30, %v323_v36 }
 0x236   : > { %v525_v38 = vpop.eup %524  ;;  %v328_v39 = vmul.f32 1.442695, %v325_v37 }
 0x237   : > { %v330_v40 = vsel %vm288_vm1, %v525_v38, 0.0 }
 0x238   : > { %526 = vpow2.f32 %v328_v39  ;;  %331 = vadd.xlane.f32.xlu0 %v330_v40 }
 0x23e   : > { %v527_v41 = vpop.eup %526 }
 0x23f   : > { %v333_v42 = vsel %vm288_vm1, %v527_v41, 0.0 }
 0x240   : > { %334 = vadd.xlane.f32.xlu2 %v333_v42 }
 0x243   : > { %v206_v55 = vpop.permute.xlu1 %205 }
 0x244   : > { %v254_v57 = vadd.f32 %v253_v54, %v206_v55 }
 0x2ab   : > { %v332_v43 = vpop.xlane.xlu0 %331 }
 0x2ac   : > { %528 = vrcp.f32 %v332_v43 }
 0x2b2   : > { %v529_v45 = vpop.eup %528 }
 0x2b3   : > { %v335_v44 = vpop.xlane.xlu2 %334  ;;  %v338_v46 = vmul.f32 %v529_v45, %v332_v43 }
 0x2b4   : > { %530 = vrcp.f32 %v335_v44 }
 0x2b5   : > { %v340_v49 = vsub.f32 2.0, %v338_v46 }
 0x2b7   : > { %v342_v52 = vmul.f32 %v529_v45, %v340_v49 }
 0x2b9   : > { %v344_v56 = vmul.f32 %v525_v38, %v342_v52 }
 0x2ba   : > { %v531_v47 = vpop.eup %530 }
 0x2bb   : > { %v339_v48 = vmul.f32 %v531_v47, %v335_v44 }
 0x2bd   : > { %v341_v50 = vsub.f32 2.0, %v339_v48 }
 0x2bf   : > { %v343_v51 = vmul.f32 %v531_v47, %v341_v50 }
 0x2c1   : > { %v345_v53 = vmul.f32 %v527_v41, %v343_v51 }
 0x2c3   : > { %465 = vmatpush.xpose.msk.msrb.mxu2 %vm288_vm1, %v345_v53 }
 0x2c7   : > { %466 = vmatpush.xpose.msk.msrb.mxu2 %vm288_vm1, %v344_v56 }
 0x2ca   : > { %467 = vmatmul.msk.f32.vlgmr.msrb.gmra.mxu2 %vm288_vm1, %v254_v57 }
 0x34d   : > { %v372_v58 = vpop.f32.mrf.mxu2 }
 0x34e   : > { %375 = vst.msk [vmem:[%s163_s10] sm:$0xff] %vm288_vm1, %v372_v58 }
 0x34f   : > { %559 = shalt.err (!%p556_p3)
}
 0x350   : > { %481 = dma.vmem_to_hbm [thread:$0]  (%p655_p5), %s390_s11, 128, %s392_s17, %s377_s19  }
 0x351 PF: > { %p487_p4 = scmp.ge.s32.totalorder %s594_s15, 2  ;;  %s403_s29 = sand.u32 1, %s582_s12  }
 0x352   : > { %s404_s30 = scalar_lea.sflag [#allocation3], %s403_s29 }
 0x353   : > { %p484_p7 = pnand %p487_p4, %p659_p6 }
 0x355   : > { %p485_p8 = pneg %p484_p7 }
 0x357   : > { %577 = dma.done.wait (%p485_p8), %s404_s30, 128  }
 0x358   : > { %579 = vsyncadd (%p485_p8), %s404_s30, 4294967168  ;;  %p13_p9 = scmp.ge.s32.totalorder %s642_s18, 4   ;;  %s753_s12 = smov %s586_s13 }
 0x359   : > { %s754_s13 = smov %s590_s14  ;;  %s755_s14 = smov %s653_s21 }
 0x35a   : > { %s756_s15 = smov %s642_s18  ;;  %15 = sbr.rel (!%p13_p9) target bundleno = 3 (0x3), region = 67 }
 0x35f   :  { %410 = vsyncpa [#allocation3], 1 }
 0x360   :  { %412 = vsyncpa [#allocation3 + $0x1], 1 }

</bundles_post_ra>
